<compile_context>
chip_gen: v7x
topology: tpu7x:2x2x1
jax: 0.10.0
libtpu: 0.0.40
codegen_flags: <defaults>
</compile_context>

<pallas_src>
from functools import partial

import jax
import jax.numpy as jnp
from jax.experimental import pallas as pl
from jax.experimental.pallas import tpu as pltpu

LANES = 128


def rodrigues_kernel(x_ref, o_ref):
    # x_ref: (3, TM, 128) f32 ; o_ref: (9, TM, 128) f32
    rx = x_ref[0]
    ry = x_ref[1]
    rz = x_ref[2]

    s = 1e-05 + rx * rx + ry * ry + rz * rz
    inv_theta = jax.lax.rsqrt(s)          # single EUP op instead of sqrt + divide
    theta = s * inv_theta                 # == sqrt(s)
    rx = rx * inv_theta
    ry = ry * inv_theta
    rz = rz * inv_theta

    # TODO(synk): if bundle dumps show jnp.cos/jnp.sin expanding to long VALU
    # polynomial chains (relevant on v6e/v7x where the per-vreg HBM budget is
    # small), share the range reduction between them / use a fused sincos.
    costh = jnp.cos(theta)
    sinth = jnp.sin(theta)
    omc = 1.0 - costh

    # shared products, computed once
    xy = rx * ry * omc
    xz = rx * rz * omc
    yz = ry * rz * omc
    xs = rx * sinth
    ys = ry * sinth
    zs = rz * sinth

    # nine lane-dense (TM, 128) stores -- keep them separate (a 9-wide lane
    # dim would force masked vst.msk stores at 9/128 lane utilization).
    o_ref[0] = costh + rx * rx * omc      # == rx^2 + (1-rx^2)*costh
    o_ref[1] = xy - zs
    o_ref[2] = xz + ys
    o_ref[3] = xy + zs
    o_ref[4] = costh + ry * ry * omc
    o_ref[5] = yz - xs
    o_ref[6] = xz - ys
    o_ref[7] = yz + xs
    o_ref[8] = costh + rz * rz * omc


@partial(jax.jit, static_argnames=("block_rows",))
def rodrigues_soa(rvec, block_rows=1024):
    """rvec: (N, 3) float32 -> SoA (9, N) float32 (row-major 3x3 entries).

    Preferred entry point: consumers that can take the SoA layout avoid a
    second full HBM pass over the 9-word-per-element output.
    """
    rvec = jnp.asarray(rvec, jnp.float32)
    N = rvec.shape[0]

    # Pad the batch only up to a whole number of 128-lane rows (nr), NOT up to
    # a multiple of TM -- the ragged final grid block is masked by Pallas.
    nr = pl.cdiv(N, LANES)
    Np = nr * LANES

    if nr <= 8:
        # Tiny batch: full-extent block (no (8,128) divisibility issue),
        # single grid step.
        TM = nr
    else:
        # At least 2 grid steps so dimension_semantics=("parallel",) actually
        # shards the work across both TensorCores on v7x; cap at block_rows
        # (1024 rows -> ~12.6 MiB double-buffered working set).
        half = pl.cdiv(nr, 2)
        TM = min(block_rows, ((half + 7) // 8) * 8)
    grid = (pl.cdiv(nr, TM),)

    # Single fused pad + transpose into the component-major SoA layout
    # (under the same jit as the pallas_call, so no separate zero-buffer +
    # dynamic-update-slice pass).
    x = jnp.pad(rvec, ((0, Np - N), (0, 0))).T.reshape(3, nr, LANES)

    out = pl.pallas_call(
        rodrigues_kernel,
        out_shape=jax.ShapeDtypeStruct((9, nr, LANES), jnp.float32),
        grid=grid,
        in_specs=[pl.BlockSpec((3, TM, LANES), lambda i: (0, i, 0))],
        out_specs=pl.BlockSpec((9, TM, LANES), lambda i: (0, i, 0)),
        compiler_params=pltpu.CompilerParams(
            dimension_semantics=("parallel",),
            # TM=1024 needs ~12.6 MiB double-buffered; raise the scoped-VMEM
            # limit explicitly so v5e (16 MiB default) compiles cleanly.
            # 32 MiB is within physical VMEM on v5e/v6e (128 MiB) and v7x (64 MiB).
            vmem_limit_bytes=32 * 1024 * 1024,
        ),
    )(x)

    # (9, nr, 128) -> (9, Np) -> (9, N)   (slice only; still SoA, no transpose)
    return out.reshape(9, Np)[:, :N]


@jax.jit
def rodrigues(rvec):
    """rvec: (N, 3) float32 -> (N, 3, 3) float32 rotation matrices.

    PyTorch-compatible AoS layout.  The SoA->AoS transpose is a second HBM
    pass over the output; consumers that can use (9, N) should call
    `rodrigues_soa` directly.
    """
    rvec = jnp.asarray(rvec, jnp.float32)
    N = rvec.shape[0]
    soa = rodrigues_soa(rvec)
    return soa.T.reshape(N, 3, 3)


def rodrigues_ref(rvec):
    """Pure-JAX reference mirroring the PyTorch forward exactly."""
    rvec = jnp.asarray(rvec, jnp.float32)
    theta = jnp.sqrt(1e-05 + jnp.sum(rvec ** 2, axis=1))
    rvec = rvec / theta[:, None]
    costh = jnp.cos(theta)
    sinth = jnp.sin(theta)
    rx, ry, rz = rvec[:, 0], rvec[:, 1], rvec[:, 2]
    m = jnp.stack(
        (
            rx ** 2 + (1.0 - rx ** 2) * costh,
            rx * ry * (1.0 - costh) - rz * sinth,
            rx * rz * (1.0 - costh) + ry * sinth,
            rx * ry * (1.0 - costh) + rz * sinth,
            ry ** 2 + (1.0 - ry ** 2) * costh,
            ry * rz * (1.0 - costh) - rx * sinth,
            rx * rz * (1.0 - costh) - ry * sinth,
            ry * rz * (1.0 - costh) + rx * sinth,
            rz ** 2 + (1.0 - rz ** 2) * costh,
        ),
        axis=1,
    )
    return m.reshape(-1, 3, 3)


if __name__ == "__main__":
    key = jax.random.PRNGKey(0)

    # Small batch (single full-extent block path).
    N_small = 8
    rvec_small = jax.random.normal(key, (N_small, 3), dtype=jnp.float32)
    out_small = jax.block_until_ready(rodrigues(rvec_small))
    ref_small = rodrigues_ref(rvec_small)
    assert out_small.shape == (N_small, 3, 3)
    assert jnp.allclose(out_small, ref_small, atol=1e-5, rtol=1e-5)

    # Ragged multi-block path (nr = 9 rows, TM = 8, grid = 2, masked tail).
    N_ragged = 9 * 128 - 3
    rvec_ragged = jax.random.normal(jax.random.PRNGKey(1), (N_ragged, 3), dtype=jnp.float32)
    out_ragged = jax.block_until_ready(rodrigues(rvec_ragged))
    ref_ragged = rodrigues_ref(rvec_ragged)
    assert out_ragged.shape == (N_ragged, 3, 3)
    assert jnp.allclose(out_ragged, ref_ragged, atol=1e-5, rtol=1e-5)

    print("KERNEL_OK")
</pallas_src>

<mosaic_0001>
module attributes {stable_mosaic.version = 11 : i64} {
  func.func @rodrigues_kernel(%arg0: i32, %arg1: memref<3x1x128xf32, #tpu.memory_space<vmem>>, %arg2: memref<9x1x128xf32, #tpu.memory_space<vmem>>) attributes {dimension_semantics = [#tpu.dimension_semantics<parallel>], iteration_bounds = array<i64: 1>, scalar_prefetch = 0 : i64, scratch_operands = 0 : i64, tpu.core_type = #tpu.core_type<tc>, window_params = [{transform_indices = @transform_0, window_bounds = array<i64: 3, 1, 128>}, {transform_indices = @transform_1, window_bounds = array<i64: 9, 1, 128>}]} {
    %c0 = arith.constant 0 : index
    %c0_0 = arith.constant 0 : index
    %c0_1 = arith.constant 0 : index
    %0 = vector.load %arg1[%c0, %c0_0, %c0_1] : memref<3x1x128xf32, #tpu.memory_space<vmem>>, vector<1x1x128xf32>
    %1 = vector.shape_cast %0 : vector<1x1x128xf32> to vector<1x128xf32>
    %c1 = arith.constant 1 : index
    %c0_2 = arith.constant 0 : index
    %c0_3 = arith.constant 0 : index
    %2 = vector.load %arg1[%c1, %c0_2, %c0_3] : memref<3x1x128xf32, #tpu.memory_space<vmem>>, vector<1x1x128xf32>
    %3 = vector.shape_cast %2 : vector<1x1x128xf32> to vector<1x128xf32>
    %c2 = arith.constant 2 : index
    %c0_4 = arith.constant 0 : index
    %c0_5 = arith.constant 0 : index
    %4 = vector.load %arg1[%c2, %c0_4, %c0_5] : memref<3x1x128xf32, #tpu.memory_space<vmem>>, vector<1x1x128xf32>
    %5 = vector.shape_cast %4 : vector<1x1x128xf32> to vector<1x128xf32>
    %6 = arith.mulf %1, %1 : vector<1x128xf32>
    %cst = arith.constant 9.99999974E-6 : f32
    %7 = vector.broadcast %cst : f32 to vector<1x128xf32>
    %8 = arith.addf %7, %6 : vector<1x128xf32>
    %9 = arith.mulf %3, %3 : vector<1x128xf32>
    %10 = arith.addf %8, %9 : vector<1x128xf32>
    %11 = arith.mulf %5, %5 : vector<1x128xf32>
    %12 = arith.addf %10, %11 : vector<1x128xf32>
    %13 = math.rsqrt %12 : vector<1x128xf32>
    %14 = arith.mulf %12, %13 : vector<1x128xf32>
    %15 = arith.mulf %1, %13 : vector<1x128xf32>
    %16 = arith.mulf %3, %13 : vector<1x128xf32>
    %17 = arith.mulf %5, %13 : vector<1x128xf32>
    %18 = math.cos %14 : vector<1x128xf32>
    %19 = math.sin %14 : vector<1x128xf32>
    %cst_6 = arith.constant 1.000000e+00 : f32
    %20 = vector.broadcast %cst_6 : f32 to vector<1x128xf32>
    %21 = arith.subf %20, %18 : vector<1x128xf32>
    %22 = arith.mulf %15, %16 : vector<1x128xf32>
    %23 = arith.mulf %22, %21 : vector<1x128xf32>
    %24 = arith.mulf %15, %17 : vector<1x128xf32>
    %25 = arith.mulf %24, %21 : vector<1x128xf32>
    %26 = arith.mulf %16, %17 : vector<1x128xf32>
    %27 = arith.mulf %26, %21 : vector<1x128xf32>
    %28 = arith.mulf %15, %19 : vector<1x128xf32>
    %29 = arith.mulf %16, %19 : vector<1x128xf32>
    %30 = arith.mulf %17, %19 : vector<1x128xf32>
    %31 = arith.mulf %15, %15 : vector<1x128xf32>
    %32 = arith.mulf %31, %21 : vector<1x128xf32>
    %33 = arith.addf %18, %32 : vector<1x128xf32>
    %c0_7 = arith.constant 0 : index
    %c0_8 = arith.constant 0 : index
    %c0_9 = arith.constant 0 : index
    %34 = vector.load %arg2[%c0_7, %c0_8, %c0_9] : memref<9x1x128xf32, #tpu.memory_space<vmem>>, vector<1x1x128xf32>
    %35 = vector.shape_cast %34 : vector<1x1x128xf32> to vector<1x128xf32>
    %36 = vector.shape_cast %33 : vector<1x128xf32> to vector<1x1x128xf32>
    tpu.vector_store %arg2[%c0_7, %c0_8, %c0_9], %36 {strides = array<i32>} : memref<9x1x128xf32, #tpu.memory_space<vmem>>, vector<1x1x128xf32>,
    %37 = arith.subf %23, %30 : vector<1x128xf32>
    %c1_10 = arith.constant 1 : index
    %c0_11 = arith.constant 0 : index
    %c0_12 = arith.constant 0 : index
    %38 = vector.load %arg2[%c1_10, %c0_11, %c0_12] : memref<9x1x128xf32, #tpu.memory_space<vmem>>, vector<1x1x128xf32>
    %39 = vector.shape_cast %38 : vector<1x1x128xf32> to vector<1x128xf32>
    %40 = vector.shape_cast %37 : vector<1x128xf32> to vector<1x1x128xf32>
    tpu.vector_store %arg2[%c1_10, %c0_11, %c0_12], %40 {strides = array<i32>} : memref<9x1x128xf32, #tpu.memory_space<vmem>>, vector<1x1x128xf32>,
    %41 = arith.addf %25, %29 : vector<1x128xf32>
    %c2_13 = arith.constant 2 : index
    %c0_14 = arith.constant 0 : index
    %c0_15 = arith.constant 0 : index
    %42 = vector.load %arg2[%c2_13, %c0_14, %c0_15] : memref<9x1x128xf32, #tpu.memory_space<vmem>>, vector<1x1x128xf32>
    %43 = vector.shape_cast %42 : vector<1x1x128xf32> to vector<1x128xf32>
    %44 = vector.shape_cast %41 : vector<1x128xf32> to vector<1x1x128xf32>
    tpu.vector_store %arg2[%c2_13, %c0_14, %c0_15], %44 {strides = array<i32>} : memref<9x1x128xf32, #tpu.memory_space<vmem>>, vector<1x1x128xf32>,
    %45 = arith.addf %23, %30 : vector<1x128xf32>
    %c3 = arith.constant 3 : index
    %c0_16 = arith.constant 0 : index
    %c0_17 = arith.constant 0 : index
    %46 = vector.load %arg2[%c3, %c0_16, %c0_17] : memref<9x1x128xf32, #tpu.memory_space<vmem>>, vector<1x1x128xf32>
    %47 = vector.shape_cast %46 : vector<1x1x128xf32> to vector<1x128xf32>
    %48 = vector.shape_cast %45 : vector<1x128xf32> to vector<1x1x128xf32>
    tpu.vector_store %arg2[%c3, %c0_16, %c0_17], %48 {strides = array<i32>} : memref<9x1x128xf32, #tpu.memory_space<vmem>>, vector<1x1x128xf32>,
    %49 = arith.mulf %16, %16 : vector<1x128xf32>
    %50 = arith.mulf %49, %21 : vector<1x128xf32>
    %51 = arith.addf %18, %50 : vector<1x128xf32>
    %c4 = arith.constant 4 : index
    %c0_18 = arith.constant 0 : index
    %c0_19 = arith.constant 0 : index
    %52 = vector.load %arg2[%c4, %c0_18, %c0_19] : memref<9x1x128xf32, #tpu.memory_space<vmem>>, vector<1x1x128xf32>
    %53 = vector.shape_cast %52 : vector<1x1x128xf32> to vector<1x128xf32>
    %54 = vector.shape_cast %51 : vector<1x128xf32> to vector<1x1x128xf32>
    tpu.vector_store %arg2[%c4, %c0_18, %c0_19], %54 {strides = array<i32>} : memref<9x1x128xf32, #tpu.memory_space<vmem>>, vector<1x1x128xf32>,
    %55 = arith.subf %27, %28 : vector<1x128xf32>
    %c5 = arith.constant 5 : index
    %c0_20 = arith.constant 0 : index
    %c0_21 = arith.constant 0 : index
    %56 = vector.load %arg2[%c5, %c0_20, %c0_21] : memref<9x1x128xf32, #tpu.memory_space<vmem>>, vector<1x1x128xf32>
    %57 = vector.shape_cast %56 : vector<1x1x128xf32> to vector<1x128xf32>
    %58 = vector.shape_cast %55 : vector<1x128xf32> to vector<1x1x128xf32>
    tpu.vector_store %arg2[%c5, %c0_20, %c0_21], %58 {strides = array<i32>} : memref<9x1x128xf32, #tpu.memory_space<vmem>>, vector<1x1x128xf32>,
    %59 = arith.subf %25, %29 : vector<1x128xf32>
    %c6 = arith.constant 6 : index
    %c0_22 = arith.constant 0 : index
    %c0_23 = arith.constant 0 : index
    %60 = vector.load %arg2[%c6, %c0_22, %c0_23] : memref<9x1x128xf32, #tpu.memory_space<vmem>>, vector<1x1x128xf32>
    %61 = vector.shape_cast %60 : vector<1x1x128xf32> to vector<1x128xf32>
    %62 = vector.shape_cast %59 : vector<1x128xf32> to vector<1x1x128xf32>
    tpu.vector_store %arg2[%c6, %c0_22, %c0_23], %62 {strides = array<i32>} : memref<9x1x128xf32, #tpu.memory_space<vmem>>, vector<1x1x128xf32>,
    %63 = arith.addf %27, %28 : vector<1x128xf32>
    %c7 = arith.constant 7 : index
    %c0_24 = arith.constant 0 : index
    %c0_25 = arith.constant 0 : index
    %64 = vector.load %arg2[%c7, %c0_24, %c0_25] : memref<9x1x128xf32, #tpu.memory_space<vmem>>, vector<1x1x128xf32>
    %65 = vector.shape_cast %64 : vector<1x1x128xf32> to vector<1x128xf32>
    %66 = vector.shape_cast %63 : vector<1x128xf32> to vector<1x1x128xf32>
    tpu.vector_store %arg2[%c7, %c0_24, %c0_25], %66 {strides = array<i32>} : memref<9x1x128xf32, #tpu.memory_space<vmem>>, vector<1x1x128xf32>,
    %67 = arith.mulf %17, %17 : vector<1x128xf32>
    %68 = arith.mulf %67, %21 : vector<1x128xf32>
    %69 = arith.addf %18, %68 : vector<1x128xf32>
    %c8 = arith.constant 8 : index
    %c0_26 = arith.constant 0 : index
    %c0_27 = arith.constant 0 : index
    %70 = vector.load %arg2[%c8, %c0_26, %c0_27] : memref<9x1x128xf32, #tpu.memory_space<vmem>>, vector<1x1x128xf32>
    %71 = vector.shape_cast %70 : vector<1x1x128xf32> to vector<1x128xf32>
    %72 = vector.shape_cast %69 : vector<1x128xf32> to vector<1x1x128xf32>
    tpu.vector_store %arg2[%c8, %c0_26, %c0_27], %72 {strides = array<i32>} : memref<9x1x128xf32, #tpu.memory_space<vmem>>, vector<1x1x128xf32>,
    return
  }
  func.func @transform_0(%arg0: i32) -> (i32, i32, i32) {
    %c0_i32 = arith.constant 0 : i32
    %c0_i32_0 = arith.constant 0 : i32
    %c0_i32_1 = arith.constant 0 : i32
    return %c0_i32, %arg0, %c0_i32_0 : i32, i32, i32
  }
  func.func @transform_1(%arg0: i32) -> (i32, i32, i32) {
    %c0_i32 = arith.constant 0 : i32
    %c0_i32_0 = arith.constant 0 : i32
    %c0_i32_1 = arith.constant 0 : i32
    return %c0_i32, %arg0, %c0_i32_0 : i32, i32, i32
  }
}

</mosaic_0001>

<bundles_post_ra>
// kernel: rodrigues_soa.1
= control target key start
LH: loop header
LB: loop body
LE: loop exit
PB: predicated region body
PF: predicated region fallthrough
CT: control target
= control target key end

     0   :  { %v311_v28 = vmov 683565275   ;;  %v312_v30 = vmov 2475754826   ;;  %v313_v32 = vmov 2131351028   ;;  %s414_s0 = inlined_call_operand.vmem [shape: f32[3,1,128], index: 0, kind: input, shape index: {}]   ;;  %s415_s1 = inlined_call_operand.vmem [shape: f32[9,1,128], index: 1, kind: output, shape index: {}]  }
   0x1   :  { %v8_v0 = vld [vmem:[%s414_s0] sm:$0x1]  ;;  %v277_v1 = vld [vmem:[%s414_s0 + $0x1] sm:$0x1]  ;;  %v278_v2 = vld [vmem:[%s414_s0 + $0x2] sm:$0x1] }
   0x2   :  { %v13_v3 = vmul.f32 %v8_v0, %v8_v0  ;;  %v15_v4 = vmul.f32 %v277_v1, %v277_v1  ;;  %v17_v6 = vmul.f32 %v278_v2, %v278_v2  ;;  %v314_v34 = vmov 2102212464  }
   0x3   :  { %v315_v36 = vmov 920167782   ;;  %v316_v43 = vmov 1326507024  }
   0x4   :  { %v14_v5 = vadd.f32 1e-05, %v13_v3 }
   0x6   :  { %v16_v7 = vadd.f32 %v15_v4, %v14_v5 }
   0x8   :  { %v18_v8 = vadd.f32 %v17_v6, %v16_v7 }
   0xa   :  { %305 = vrsqrt.f32 %v18_v8 }
  0x14   :  { %v306_v9 = vpop.eup %305 }
  0x15   :  { %v336_v10 = vmul.f32 %v306_v9, %v18_v8  ;;  %v338_v11 = vmul.f32 %v306_v9, %v8_v0  ;;  %v340_v12 = vmul.f32 %v306_v9, %v277_v1  ;;  %v342_v13 = vmul.f32 %v306_v9, %v278_v2 }
  0x17   :  { %v27_v14 = vand.u32 2139095040, %v336_v10  ;;  %v347_v15 = vmul.f32 %v340_v12, %v338_v11  ;;  %v351_v16 = vmul.f32 %v342_v13, %v338_v11  ;;  %v355_v18 = vmul.f32 %v342_v13, %v340_v12 }
  0x18   :  { %v24_v19 = vand.u32 2147483647, %v336_v10  ;;  %vm26_vm7 = vcmp.lt.s32.totalorder %v336_v10, 0  ;;  %vm116_vm15 = vweird.f32 %v336_v10 }
  0x19   :  { %v28_v17 = vshrl.u32 %v27_v14, 23 }
  0x1a   :  { %v31_v22 = vand.u32 8388607, %v24_v19  ;;  %vm25_vm8 = vcmp.le.f32.partialorder %v24_v19, 0.7853982 }
  0x1b   :  { %v279_v20 = vadd.s32 4294967169, %v28_v17 }
  0x1c   :  { %v32_v25 = vor.u32 8388608, %v31_v22 }
  0x1d   :  { %v34_v21 = vadd.s32 1, %v279_v20 }
  0x1e   :  { %v72_v45 = vshll.u32 %v32_v25, 8 }
  0x1f   :  { %vm35_vm0 = vcmp.gt.s32.totalorder %v34_v21, 0 }
  0x20   :  { %v36_v23 = vsel %vm35_vm0, %v34_v21, 0 }
  0x21   :  { %v38_v24 = vand.u32 31, %v36_v23  ;;  %v37_v26 = vshrl.u32 %v36_v23, 5 }
  0x23   :  { %v39_v27 = vsub.s32 32, %v38_v24  ;;  %v41_v29 = vshll.u32 %v311_v28, %v38_v24  ;;  %v44_v31 = vshll.u32 %v312_v30, %v38_v24  ;;  %v47_v33 = vshll.u32 %v313_v32, %v38_v24 }
  0x24   :  { %v50_v35 = vshll.u32 %v314_v34, %v38_v24  ;;  %v53_v37 = vshll.u32 %v315_v36, %v38_v24  ;;  %vm56_vm1 = vcmp.lt.s32.totalorder %v37_v26, 1  ;;  %vm59_vm2 = vcmp.lt.s32.totalorder %v37_v26, 4 }
  0x25   :  { %v40_v38 = vshrl.u32 %v311_v28, %v39_v27  ;;  %v42_v39 = vshrl.u32 %v312_v30, %v39_v27  ;;  %v45_v40 = vshrl.u32 %v313_v32, %v39_v27  ;;  %v48_v41 = vshrl.u32 %v314_v34, %v39_v27 }
  0x26   :  { %v51_v42 = vshrl.u32 %v315_v36, %v39_v27  ;;  %v54_v44 = vshrl.u32 %v316_v43, %v39_v27  ;;  %vm57_vm3 = vcmp.lt.s32.totalorder %v37_v26, 2  ;;  %vm58_vm4 = vcmp.lt.s32.totalorder %v37_v26, 3 }
  0x27   :  { %v43_v46 = vor.u32 %v42_v39, %v41_v29  ;;  %v46_v47 = vor.u32 %v45_v40, %v44_v31  ;;  %v49_v48 = vor.u32 %v48_v41, %v47_v33 }
  0x28   :  { %v52_v49 = vor.u32 %v51_v42, %v50_v35  ;;  %v55_v50 = vor.u32 %v54_v44, %v53_v37 }
  0x29   :  { %v60_v51 = vsel %vm56_vm1, %v40_v38, %v43_v46  ;;  %v61_v52 = vsel %vm59_vm2, %v49_v48, 2102212464  ;;  %v64_v53 = vsel %vm56_vm1, %v43_v46, %v46_v47  ;;  %v68_v54 = vsel %vm56_vm1, %v46_v47, %v49_v48 }
  0x2a   :  { %v62_v55 = vsel %vm58_vm4, %v46_v47, %v61_v52  ;;  %v65_v56 = vsel %vm59_vm2, %v52_v49, 920167782  ;;  %v69_v57 = vsel %vm59_vm2, %v55_v50, 1326507024 }
  0x2b   :  { %v66_v58 = vsel %vm58_vm4, %v49_v48, %v65_v56  ;;  %v70_v59 = vsel %vm58_vm4, %v52_v49, %v69_v57  ;;  %v63_v60 = vsel %vm57_vm3, %v60_v51, %v62_v55  ;;  %v254_v55 = vmul.f32 %v340_v12, %v340_v12 }
  0x2c   :  { %v67_v61 = vsel %vm57_vm3, %v64_v53, %v66_v58  ;;  %v71_v62 = vsel %vm57_vm3, %v68_v54, %v70_v59  ;;  %v79_v3 = vmul.u32 %v72_v45, %v63_v60  ;;  %v241_v53 = vmul.f32 %v338_v11, %v338_v11 }
  0x2d   :  { %v360_v63 = vmul.u32.u64.low %v72_v45, %v71_v62  ;;  %v361_v0 = vmul.u32.u64.high %v72_v45, %v71_v62, %v360_v63  ;;  %v363_v1 = vmul.u32.u64.low %v72_v45, %v67_v61  ;;  %v364_v2 = vmul.u32.u64.high %v72_v45, %v67_v61, %v363_v1 }
  0x2e   :  { %v268_v58 = vmul.f32 %v342_v13, %v342_v13 }
  0x2f   :  { %vm81_vm5 = vc.u32 %v361_v0, %v363_v1  ;;  %v82_v4 = vadd.s32 1, %v364_v2  ;;  %v80_v23 = vadd.s32 %v363_v1, %v361_v0 }
  0x31   :  { %v83_v5 = vsel %vm81_vm5, %v82_v4, %v364_v2 }
  0x32   :  { %v84_v6 = vadd.s32 %v83_v5, %v79_v3 }
  0x34   :  { %v85_v7 = vadd.s32 536870912, %v84_v6 }
  0x36   :  { %v86_v8 = vshrl.u32 %v85_v7, 30 }
  0x38   :  { %v87_v9 = vshll.u32 %v86_v8, 30  ;;  %v110_v35 = vsub.s32 4, %v86_v8 }
  0x3a   :  { %v88_v14 = vsub.s32 %v84_v6, %v87_v9  ;;  %v111_v38 = vsel %vm26_vm7, %v110_v35, %v86_v8 }
  0x3b   :  { %v113_v41 = vsel %vm25_vm8, 0, %v111_v38 }
  0x3c   :  { %v90_v17 = vsub.s32 0, %v88_v14  ;;  %v220_v42 = vadd.s32 3, %v113_v41  ;;  %v117_v43 = vand.u32 3, %v113_v41 }
  0x3e   :  { %v280_v20 = vmin.u32 %v90_v17, %v88_v14  ;;  %v221_v44 = vand.u32 3, %v220_v42  ;;  %vm122_vm9 = vcmp.eq.s32.totalorder %v117_v43, 2  ;;  %vm119_vm11 = vcmp.eq.s32.totalorder %v117_v43, 0 }
  0x3f   :  { %vm118_vm13 = vcmp.lt.s32.totalorder %v117_v43, 2 }
  0x40   :  { %v92_v21 = vclz %v280_v20  ;;  %vm226_vm10 = vcmp.eq.s32.totalorder %v221_v44, 2  ;;  %vm223_vm12 = vcmp.eq.s32.totalorder %v221_v44, 0  ;;  %vm222_vm14 = vcmp.lt.s32.totalorder %v221_v44, 2 }
  0x42   :  { %v281_v22 = vadd.s32 4294967294, %v92_v21 }
  0x44   :  { %vm282_vm6 = vcmp.lt.s32.totalorder %v281_v22, 0 }
  0x45   :  { %v95_v24 = vsel %vm282_vm6, 0, %v281_v22 }
  0x46   :  { %v96_v25 = vsub.s32 32, %v95_v24  ;;  %v97_v26 = vshll.u32 %v88_v14, %v95_v24  ;;  %v100_v27 = vsub.s32 4294967266, %v95_v24 }
  0x48   :  { %v98_v28 = vshrl.u32 %v80_v23, %v96_v25  ;;  %v101_v29 = vadd.s32 127, %v100_v27 }
  0x4a   :  { %v99_v30 = vor.u32 %v98_v28, %v97_v26  ;;  %v102_v31 = vshll.u32 %v101_v29, 23 }
  0x4c   :  { %v103_v32 = vor.u32 4788187, %v102_v31  ;;  %v106_v33 = vcvt.s32.f32 %v99_v30 }
  0x4e   :  { %v104_v34 = vand.u32 2147483647, %v103_v32 }
  0x50   :  { %v107_v36 = vmul.f32 %v106_v33, %v104_v34 }
  0x52   :  { %v108_v37 = vxor.u32 2147483648, %v107_v36 }
  0x54   :  { %v109_v39 = vsel %vm26_vm7, %v108_v37, %v107_v36 }
  0x55   :  { %v112_v40 = vsel %vm25_vm8, %v336_v10, %v109_v39 }
  0x56   :  { %307 = vcosq.f32 %v112_v40 }
  0x57   :  { %309 = vsinq.f32 %v112_v40 }
  0x60   :  { %v308_v45 = vpop.eup %307 }
  0x61   :  { %v310_v46 = vpop.eup %309  ;;  %v123_v47 = vxor.u32 2147483648, %v308_v45 }
  0x62   :  { %v120_v19 = vxor.u32 2147483648, %v310_v46 }
  0x63   :  { %v124_v48 = vsel %vm122_vm9, %v123_v47, %v310_v46  ;;  %v228_v49 = vsel %vm226_vm10, %v123_v47, %v310_v46 }
  0x64   :  { %v121_v50 = vsel %vm119_vm11, %v308_v45, %v120_v19  ;;  %v225_v51 = vsel %vm223_vm12, %v308_v45, %v120_v19 }
  0x65   :  { %v125_v52 = vsel %vm118_vm13, %v121_v50, %v124_v48  ;;  %v229_v54 = vsel %vm222_vm14, %v225_v51, %v228_v49 }
  0x66   :  { %v126_v56 = vsel %vm116_vm15, nan, %v125_v52  ;;  %v230_v57 = vsel %vm116_vm15, nan, %v229_v54 }
  0x67   :  { %v231_v59 = vsub.f32 1.0, %v126_v56  ;;  %v240_v10 = vmul.f32 %v230_v57, %v342_v13  ;;  %v239_v60 = vmul.f32 %v230_v57, %v340_v12  ;;  %v238_v61 = vmul.f32 %v230_v57, %v338_v11 }
  0x69   :  { %v242_v62 = vmul.f32 %v241_v53, %v231_v59  ;;  %v233_v63 = vmul.f32 %v347_v15, %v231_v59  ;;  %v235_v0 = vmul.f32 %v351_v16, %v231_v59  ;;  %v255_v1 = vmul.f32 %v254_v55, %v231_v59 }
  0x6a   :  { %v237_v2 = vmul.f32 %v355_v18, %v231_v59  ;;  %v269_v3 = vmul.f32 %v268_v58, %v231_v59 }
  0x6b   :  { %v243_v4 = vadd.f32 %v242_v62, %v126_v56  ;;  %v245_v5 = vsub.f32 %v233_v63, %v240_v10  ;;  %v248_v6 = vadd.f32 %v239_v60, %v235_v0  ;;  %v251_v7 = vadd.f32 %v240_v10, %v233_v63 }
  0x6c   :  { %v256_v8 = vadd.f32 %v255_v1, %v126_v56  ;;  %v259_v9 = vsub.f32 %v237_v2, %v238_v61  ;;  %v262_v13 = vsub.f32 %v235_v0, %v239_v60  ;;  %v265_v14 = vadd.f32 %v238_v61, %v237_v2 }
  0x6d   :  { %244 = vst [vmem:[%s415_s1] sm:$0x1] %v243_v4  ;;  %287 = vst [vmem:[%s415_s1 + $0x1] sm:$0x1] %v245_v5  ;;  %v270_v11 = vadd.f32 %v269_v3, %v126_v56 }
  0x6e   :  { %288 = vst [vmem:[%s415_s1 + $0x2] sm:$0x1] %v248_v6  ;;  %289 = vst [vmem:[%s415_s1 + $0x3] sm:$0x1] %v251_v7 }
  0x6f   :  { %290 = vst [vmem:[%s415_s1 + $0x4] sm:$0x1] %v256_v8  ;;  %291 = vst [vmem:[%s415_s1 + $0x5] sm:$0x1] %v259_v9 }
  0x70   :  { %292 = vst [vmem:[%s415_s1 + $0x6] sm:$0x1] %v262_v13  ;;  %293 = vst [vmem:[%s415_s1 + $0x7] sm:$0x1] %v265_v14 }
  0x71   :  { %294 = vst [vmem:[%s415_s1 + $0x8] sm:$0x1] %v270_v11 }

</bundles_post_ra>
